<compile_context>
chip_gen: v6e
topology: v6e:2x2x1
jax: 0.10.0
libtpu: 0.0.40
codegen_flags: <defaults>
</compile_context>

<pallas_src>
import jax
import jax.numpy as jnp
from jax.experimental import pallas as pl
from jax.experimental.pallas import tpu as pltpu

# ---------------- problem sizes (small, consistent with the module) ----------
SEQ_LEN    = 8
BATCH_SIZE = 8
DIM_IN     = 2
DIM_HIDDEN = 32
DIM_OUT    = 1


# ---------------------------- Pallas kernel ----------------------------------
def rnn_kernel(xs_ref, params_ref, b2_ref, out_ref):
    """Whole RNN in one grid-less invocation (everything fits in VMEM).

    xs_ref    : (SEQ*B, DIM_IN)        VMEM  (flattened in the wrapper)
    params_ref: (H + DIM_IN + 2, H)    VMEM  packed parameters:
                  rows [0, H)                 -> W1h          (H, H)
                  rows [H, H+DIM_IN)          -> W1x          (DIM_IN, H)
                  row  H+DIM_IN               -> b1           (1, H)
                  row  H+DIM_IN+1             -> W2^T         (1, H)  (DIM_OUT==1)
    b2_ref    : (1, 1)                 SMEM  scalar bias
    out_ref   : (B, DIM_OUT)           VMEM
    """
    batch  = out_ref.shape[0]
    hid    = params_ref.shape[1]
    dim_in = params_ref.shape[0] - hid - 2
    seq    = xs_ref.shape[0] // batch

    # W1h loaded once; stays live across the whole unrolled recurrence so the
    # MXU RHS only needs to be staged a single time.
    w1h = params_ref[0:hid, :]                                  # (H, H)

    # (2)+(3) Input projection + b1 on the VPU: dim_in is tiny (2), so use
    # broadcast FMAs instead of an MXU matmul with K padded to systolic depth.
    precomp = xs_ref[:, 0:1] * params_ref[hid:hid + 1, :]       # (SEQ*B, H)
    for d in range(1, dim_in):                                  # static loop
        precomp = precomp + xs_ref[:, d:d + 1] * params_ref[hid + d:hid + d + 1, :]
    precomp = precomp + params_ref[hid + dim_in:hid + dim_in + 1, :]   # + b1

    # (1) Peeled t=0 step: initial hidden state is zero, so no dot needed.
    h = jnp.tanh(precomp[0:batch, :])                           # (B, H)

    # Fully unrolled recurrence (seq is a static Python int). Each step:
    # one (B,H)@(H,H) MXU matmul + VPU add + EUP tanh on the critical path.
    for t in range(1, seq):
        pre_t = precomp[t * batch:(t + 1) * batch, :]           # static slice
        h = jnp.tanh(pre_t + jnp.dot(h, w1h,
                                     preferred_element_type=jnp.float32))

    # (4) Output head on VPU + lane-reduce (DIM_OUT == 1): h*(W2^T) summed over
    # the hidden (lane) axis; b2 added as an SMEM scalar splat.
    w2t = params_ref[hid + dim_in + 1:hid + dim_in + 2, :]      # (1, H)
    out_ref[...] = (jnp.sum(h * w2t, axis=-1, keepdims=True)
                    + b2_ref[0, 0])


def rnn_forward(xs, W1x, W1h, b1, W2, b2):
    """Wrapper: layout plumbing + pallas_call. Single grid-less invocation with
    full-array VMEM blocks (total footprint ~16 KB, far under any VMEM limit)."""
    seq, batch, dim_in = xs.shape
    hid     = W1h.shape[0]
    dim_out = W2.shape[1]
    assert dim_out == 1  # module's b2 is a scalar; VPU output head assumes N=1

    xs_flat = xs.reshape(seq * batch, dim_in).astype(jnp.float32)

    # Pack all (k, H)-shaped parameters into one array -> one HBM->VMEM DMA.
    params = jnp.concatenate(
        [W1h.astype(jnp.float32),                                # (H, H)
         W1x.astype(jnp.float32),                                # (dim_in, H)
         b1.reshape(1, hid).astype(jnp.float32),                 # (1, H)
         W2.astype(jnp.float32).reshape(hid, dim_out).T],        # (1, H)
        axis=0)                                                  # (H+dim_in+2, H)

    b2_2d = jnp.asarray(b2, jnp.float32).reshape(1, 1)           # SMEM scalar

    out = pl.pallas_call(
        rnn_kernel,
        out_shape=jax.ShapeDtypeStruct((batch, dim_out), jnp.float32),
        in_specs=[
            pl.BlockSpec(memory_space=pltpu.MemorySpace.VMEM),   # xs_flat
            pl.BlockSpec(memory_space=pltpu.MemorySpace.VMEM),   # packed params
            pl.BlockSpec(memory_space=pltpu.MemorySpace.SMEM),   # b2 scalar
        ],
        out_specs=pl.BlockSpec(memory_space=pltpu.MemorySpace.VMEM),
    )(xs_flat, params, b2_2d)
    return out


# --------------------------- pure-JAX reference -------------------------------
def rnn_reference(xs, W1x, W1h, b1, W2, b2):
    h = jnp.zeros((xs.shape[1], W1h.shape[0]), jnp.float32)
    for t in range(xs.shape[0]):
        h = jnp.tanh(xs[t] @ W1x + h @ W1h + b1)
    return h @ W2 + b2


# --------------------------------- main ---------------------------------------
if __name__ == "__main__":
    key = jax.random.PRNGKey(0)
    k_x, k_w1x, k_w1h, k_w2 = jax.random.split(key, 4)

    # Deterministic parameter init mirroring the module's __init__:
    W1x = 0.1 * jax.random.normal(k_w1x, (DIM_IN, DIM_HIDDEN), jnp.float32)
    # random orthogonal W1h (get_rand_orth)
    tmp = jax.random.normal(k_w1h, (DIM_HIDDEN, DIM_HIDDEN), jnp.float32)
    q, _ = jnp.linalg.qr(tmp)
    W1h = q.astype(jnp.float32)
    b1  = jnp.zeros((DIM_HIDDEN,), jnp.float32)
    W2  = 0.1 * jax.random.normal(k_w2, (DIM_HIDDEN, DIM_OUT), jnp.float32)
    b2  = jnp.zeros((), jnp.float32)

    xs = jax.random.normal(k_x, (SEQ_LEN, BATCH_SIZE, DIM_IN), jnp.float32)

    out = jax.jit(rnn_forward)(xs, W1x, W1h, b1, W2, b2)
    out = jax.block_until_ready(out)

    ref = rnn_reference(xs, W1x, W1h, b1, W2, b2)
    assert out.shape == (BATCH_SIZE, DIM_OUT)
    assert jnp.allclose(out, ref, atol=1e-5, rtol=1e-5), (out, ref)

    print("KERNEL_OK")
</pallas_src>

<mosaic_0001>
module attributes {stable_mosaic.version = 11 : i64} {
  func.func @rnn_kernel(%arg0: memref<64x2xf32, #tpu.memory_space<vmem>>, %arg1: memref<36x32xf32, #tpu.memory_space<vmem>>, %arg2: memref<1x1xf32, #tpu.memory_space<smem>>, %arg3: memref<8x1xf32, #tpu.memory_space<vmem>>) attributes {dimension_semantics = [], scalar_prefetch = 0 : i64, scratch_operands = 0 : i64, tpu.core_type = #tpu.core_type<tc>} {
    %c0 = arith.constant 0 : index
    %c0_0 = arith.constant 0 : index
    %0 = vector.load %arg1[%c0, %c0_0] : memref<36x32xf32, #tpu.memory_space<vmem>>, vector<32x32xf32>
    %c0_1 = arith.constant 0 : index
    %c0_2 = arith.constant 0 : index
    %1 = vector.load %arg0[%c0_1, %c0_2] : memref<64x2xf32, #tpu.memory_space<vmem>>, vector<64x1xf32>
    %c32 = arith.constant 32 : index
    %c0_3 = arith.constant 0 : index
    %2 = vector.load %arg1[%c32, %c0_3] : memref<36x32xf32, #tpu.memory_space<vmem>>, vector<1x32xf32>
    %3 = vector.broadcast %1 : vector<64x1xf32> to vector<64x32xf32>
    %4 = vector.broadcast %2 : vector<1x32xf32> to vector<64x32xf32>
    %5 = arith.mulf %3, %4 : vector<64x32xf32>
    %c0_4 = arith.constant 0 : index
    %c1 = arith.constant 1 : index
    %6 = vector.load %arg0[%c0_4, %c1] : memref<64x2xf32, #tpu.memory_space<vmem>>, vector<64x1xf32>
    %c33 = arith.constant 33 : index
    %c0_5 = arith.constant 0 : index
    %7 = vector.load %arg1[%c33, %c0_5] : memref<36x32xf32, #tpu.memory_space<vmem>>, vector<1x32xf32>
    %8 = vector.broadcast %6 : vector<64x1xf32> to vector<64x32xf32>
    %9 = vector.broadcast %7 : vector<1x32xf32> to vector<64x32xf32>
    %10 = arith.mulf %8, %9 : vector<64x32xf32>
    %11 = arith.addf %5, %10 : vector<64x32xf32>
    %c34 = arith.constant 34 : index
    %c0_6 = arith.constant 0 : index
    %12 = vector.load %arg1[%c34, %c0_6] : memref<36x32xf32, #tpu.memory_space<vmem>>, vector<1x32xf32>
    %13 = vector.broadcast %12 : vector<1x32xf32> to vector<64x32xf32>
    %14 = arith.addf %11, %13 : vector<64x32xf32>
    %15 = vector.extract_strided_slice %14 {offsets = [0, 0], sizes = [8, 32], strides = [1, 1]} : vector<64x32xf32> to vector<8x32xf32>
    %16 = math.tanh %15 : vector<8x32xf32>
    %17 = vector.extract_strided_slice %14 {offsets = [8, 0], sizes = [8, 32], strides = [1, 1]} : vector<64x32xf32> to vector<8x32xf32>
    %cst = arith.constant dense<0.000000e+00> : vector<8x32xf32>
    %18 = tpu.matmul %16, %0, %cst {dimension_numbers = #tpu.dot_dimension_numbers<[1], [0], [0], [1], [0, 0, 1, 1], [], []>} : vector<8x32xf32>, vector<32x32xf32>, vector<8x32xf32> -> vector<8x32xf32>
    %19 = arith.addf %17, %18 : vector<8x32xf32>
    %20 = math.tanh %19 : vector<8x32xf32>
    %21 = vector.extract_strided_slice %14 {offsets = [16, 0], sizes = [8, 32], strides = [1, 1]} : vector<64x32xf32> to vector<8x32xf32>
    %cst_7 = arith.constant dense<0.000000e+00> : vector<8x32xf32>
    %22 = tpu.matmul %20, %0, %cst_7 {dimension_numbers = #tpu.dot_dimension_numbers<[1], [0], [0], [1], [0, 0, 1, 1], [], []>} : vector<8x32xf32>, vector<32x32xf32>, vector<8x32xf32> -> vector<8x32xf32>
    %23 = arith.addf %21, %22 : vector<8x32xf32>
    %24 = math.tanh %23 : vector<8x32xf32>
    %25 = vector.extract_strided_slice %14 {offsets = [24, 0], sizes = [8, 32], strides = [1, 1]} : vector<64x32xf32> to vector<8x32xf32>
    %cst_8 = arith.constant dense<0.000000e+00> : vector<8x32xf32>
    %26 = tpu.matmul %24, %0, %cst_8 {dimension_numbers = #tpu.dot_dimension_numbers<[1], [0], [0], [1], [0, 0, 1, 1], [], []>} : vector<8x32xf32>, vector<32x32xf32>, vector<8x32xf32> -> vector<8x32xf32>
    %27 = arith.addf %25, %26 : vector<8x32xf32>
    %28 = math.tanh %27 : vector<8x32xf32>
    %29 = vector.extract_strided_slice %14 {offsets = [32, 0], sizes = [8, 32], strides = [1, 1]} : vector<64x32xf32> to vector<8x32xf32>
    %cst_9 = arith.constant dense<0.000000e+00> : vector<8x32xf32>
    %30 = tpu.matmul %28, %0, %cst_9 {dimension_numbers = #tpu.dot_dimension_numbers<[1], [0], [0], [1], [0, 0, 1, 1], [], []>} : vector<8x32xf32>, vector<32x32xf32>, vector<8x32xf32> -> vector<8x32xf32>
    %31 = arith.addf %29, %30 : vector<8x32xf32>
    %32 = math.tanh %31 : vector<8x32xf32>
    %33 = vector.extract_strided_slice %14 {offsets = [40, 0], sizes = [8, 32], strides = [1, 1]} : vector<64x32xf32> to vector<8x32xf32>
    %cst_10 = arith.constant dense<0.000000e+00> : vector<8x32xf32>
    %34 = tpu.matmul %32, %0, %cst_10 {dimension_numbers = #tpu.dot_dimension_numbers<[1], [0], [0], [1], [0, 0, 1, 1], [], []>} : vector<8x32xf32>, vector<32x32xf32>, vector<8x32xf32> -> vector<8x32xf32>
    %35 = arith.addf %33, %34 : vector<8x32xf32>
    %36 = math.tanh %35 : vector<8x32xf32>
    %37 = vector.extract_strided_slice %14 {offsets = [48, 0], sizes = [8, 32], strides = [1, 1]} : vector<64x32xf32> to vector<8x32xf32>
    %cst_11 = arith.constant dense<0.000000e+00> : vector<8x32xf32>
    %38 = tpu.matmul %36, %0, %cst_11 {dimension_numbers = #tpu.dot_dimension_numbers<[1], [0], [0], [1], [0, 0, 1, 1], [], []>} : vector<8x32xf32>, vector<32x32xf32>, vector<8x32xf32> -> vector<8x32xf32>
    %39 = arith.addf %37, %38 : vector<8x32xf32>
    %40 = math.tanh %39 : vector<8x32xf32>
    %41 = vector.extract_strided_slice %14 {offsets = [56, 0], sizes = [8, 32], strides = [1, 1]} : vector<64x32xf32> to vector<8x32xf32>
    %cst_12 = arith.constant dense<0.000000e+00> : vector<8x32xf32>
    %42 = tpu.matmul %40, %0, %cst_12 {dimension_numbers = #tpu.dot_dimension_numbers<[1], [0], [0], [1], [0, 0, 1, 1], [], []>} : vector<8x32xf32>, vector<32x32xf32>, vector<8x32xf32> -> vector<8x32xf32>
    %43 = arith.addf %41, %42 : vector<8x32xf32>
    %44 = math.tanh %43 : vector<8x32xf32>
    %c35 = arith.constant 35 : index
    %c0_13 = arith.constant 0 : index
    %45 = vector.load %arg1[%c35, %c0_13] : memref<36x32xf32, #tpu.memory_space<vmem>>, vector<1x32xf32>
    %46 = vector.broadcast %45 : vector<1x32xf32> to vector<8x32xf32>
    %47 = arith.mulf %44, %46 : vector<8x32xf32>
    %cst_14 = arith.constant dense<0.000000e+00> : vector<8xf32>
    %48 = vector.multi_reduction <add>, %47, %cst_14 [1] : vector<8x32xf32> to vector<8xf32>
    %49 = vector.shape_cast %48 : vector<8xf32> to vector<8x1xf32>
    %c0_15 = arith.constant 0 : index
    %c0_16 = arith.constant 0 : index
    %50 = memref.load %arg2[%c0_15, %c0_16] : memref<1x1xf32, #tpu.memory_space<smem>>
    %51 = vector.broadcast %50 : f32 to vector<8x1xf32>
    %52 = arith.addf %49, %51 : vector<8x1xf32>
    %c0_17 = arith.constant 0 : index
    %c0_18 = arith.constant 0 : index
    %53 = vector.load %arg3[%c0_17, %c0_18] : memref<8x1xf32, #tpu.memory_space<vmem>>, vector<8x1xf32>
    tpu.vector_store %arg3[%c0_17, %c0_18], %52 {strides = array<i32>} : memref<8x1xf32, #tpu.memory_space<vmem>>, vector<8x1xf32>,
    return
  }
}

</mosaic_0001>

<bundles_post_ra>
// kernel: rnn_forward.1
= control target key start
LH: loop header
LB: loop body
LE: loop exit
PB: predicated region body
PF: predicated region fallthrough
CT: control target
= control target key end

     0   :  { %v839_v0 = vmov 0   ;;  %v840_v3 = vmov 1   ;;  %v841_v6 = vmov 0.0   ;;  %vm842_vm0 = vmmov 0   ;;  %s1018_s0 = inlined_call_operand.vmem [shape: f32[64,2], index: 0, kind: input, shape index: {}]   ;;  %s1019_s1 = inlined_call_operand.vmem [shape: f32[36,32], index: 1, kind: input, shape index: {}]   ;;  %s1020_s2 = inlined_call_operand.<no memory space> [shape: f32[1,1], index: 2, kind: input, shape index: {}]   ;;  %s1021_s3 = inlined_call_operand.vmem [shape: f32[8,1], index: 3, kind: output, shape index: {}]  }
   0x1   :  { %820 = vset.pattern.permute.xlu1 %v839_v0  ;;  %818 = vset.pattern.permute.xlu0 %v839_v0  ;;  %v20_v1 = vld [vmem:[%s1018_s0 + $0x8] sm:$0xff]  ;;  %v19_v2 = vld [vmem:[%s1018_s0] sm:$0xff]  ;;  %v21_v4 = vld [vmem:[%s1018_s0 + $0x10] sm:$0xff]  ;;  %vm147_vm1 = vcmask 261120   ;;  %vm685_vm2 = vcmask 7168  }
   0x2   :  { %35 = vperm.xlu1 %820, %v20_v1   ;;  %30 = vperm.xlu0 %818, %v19_v2   ;;  %v22_v5 = vld [vmem:[%s1018_s0 + $0x18] sm:$0xff]  ;;  %v23_v8 = vld [vmem:[%s1018_s0 + $0x20] sm:$0xff]  ;;  %v889_v9 = vld [vmem:[%s1019_s1 + $0x10] sm:$0xff] }
   0x3   :  { %737 = vmatprep.subr.mxu0 %v841_v6  ;;  %v879_v7 = vld [vmem:[%s1019_s1 + $0x18] sm:$0xff]  ;;  %748 = vmatprep.subr.mxu1 %v841_v6  ;;  %v898_v10 = vld [vmem:[%s1019_s1 + $0x8] sm:$0xff]  ;;  %v908_v12 = vld [vmem:[%s1019_s1] sm:$0xff] }
   0x4   :  { %738 = vmatpush3.msra.mxu0 %v879_v7  ;;  %749 = vmatpush3.msra.mxu1 %v879_v7  ;;  %v24_v11 = vld [vmem:[%s1018_s0 + $0x28] sm:$0xff]  ;;  %v25_v13 = vld [vmem:[%s1018_s0 + $0x30] sm:$0xff]  ;;  %v26_v14 = vld [vmem:[%s1018_s0 + $0x38] sm:$0xff] }
   0x5   :  { %739 = vmatprep.subr.mxu0 %v841_v6  ;;  %750 = vmatprep.subr.mxu1 %v841_v6  ;;  %v691_v17 = vld [vmem:[%s1019_s1 + $0x20] ss:$0 sm:$0xff]  ;;  %v692_v18 = vld [vmem:[%s1019_s1 + $0x21] ss:$0 sm:$0xff]  ;;  %v693_v25 = vld [vmem:[%s1019_s1 + $0x22] ss:$0 sm:$0xff] }
   0x6   :  { %821 = vset.pattern.permute.xlu1 %v840_v3  ;;  %819 = vset.pattern.permute.xlu0 %v840_v3 }
   0x7   :  { %86 = vperm.xlu1 %821, %v20_v1   ;;  %82 = vperm.xlu0 %819, %v19_v2  }
   0x8   :  { %740 = vmatpush3.msra.mxu0 %v889_v9  ;;  %745 = vmatprep.mubr.msk.f32.mxu0 %vm842_vm0, %v841_v6 }
   0x9   :  { %741 = vmatprep.subr.mxu0 %v841_v6  ;;  %751 = vmatpush3.msra.mxu1 %v889_v9 }
   0xa   :  { %742 = vmatpush3.msra.mxu0 %v898_v10  ;;  %752 = vmatprep.subr.mxu1 %v841_v6 }
   0xb   :  { %822 = vset.pattern.permute.xlu1 %v839_v0  ;;  %90 = vperm.xlu0 %819, %v21_v4  }
   0xc   :  { %40 = vperm.xlu1 %822, %v21_v4   ;;  %743 = vmatprep.subr.mxu0 %v841_v6 }
   0xd   :  { %744 = vmatpush3.msra.mxu0 %v908_v12  ;;  %753 = vmatpush3.msra.mxu1 %v898_v10 }
   0xe   :  { %756 = vmatprep.mubr.msk.f32.mxu1 %vm842_vm0, %v841_v6  ;;  %754 = vmatprep.subr.mxu1 %v841_v6 }
   0xf   :  { %94 = vperm.xlu0 %819, %v22_v5   ;;  %759 = vmatprep.subr.mxu0 %v841_v6 }
  0x10   :  { %45 = vperm.xlu1 %822, %v22_v5   ;;  %755 = vmatpush3.msra.mxu1 %v908_v12 }
  0x11   :  { %770 = vmatprep.subr.mxu1 %v841_v6 }
  0x13   :  { %98 = vperm.xlu0 %819, %v23_v8  }
  0x14   :  { %50 = vperm.xlu1 %822, %v23_v8  }
  0x17   :  { %102 = vperm.xlu0 %819, %v24_v11  }
  0x18   :  { %55 = vperm.xlu1 %822, %v24_v11  }
  0x1b   :  { %106 = vperm.xlu0 %819, %v25_v13  }
  0x1c   :  { %60 = vperm.xlu1 %822, %v25_v13  }
  0x1f   :  { %110 = vperm.xlu0 %819, %v26_v14  }
  0x20   :  { %65 = vperm.xlu1 %822, %v26_v14  }
  0x7d   :  { %v31_v15 = vpop.permute.xlu0 %30  ;;  %v36_v16 = vpop.permute.xlu1 %35 }
  0x7e   :  { %v73_v19 = vmul.f32 %v691_v17, %v36_v16  ;;  %v72_v22 = vmul.f32 %v691_v17, %v31_v15 }
  0x82   :  { %v83_v20 = vpop.permute.xlu0 %82  ;;  %v87_v21 = vpop.permute.xlu1 %86 }
  0x83   :  { %v117_v23 = vmul.f32 %v692_v18, %v83_v20  ;;  %v118_v24 = vmul.f32 %v692_v18, %v87_v21 }
  0x85   :  { %v125_v26 = vadd.f32 %v117_v23, %v72_v22  ;;  %v126_v27 = vadd.f32 %v118_v24, %v73_v19 }
  0x86   :  { %v91_v28 = vpop.permute.xlu0 %90 }
  0x87   :  { %v138_v29 = vadd.f32 %v693_v25, %v125_v26  ;;  %v119_v30 = vmul.f32 %v692_v18, %v91_v28  ;;  %v41_v31 = vpop.permute.xlu1 %40  ;;  %v139_v32 = vadd.f32 %v693_v25, %v126_v27 }
  0x88   :  { %v74_v33 = vmul.f32 %v691_v17, %v41_v31 }
  0x89   :  { %823 = vtanh.f32 %v138_v29 }
  0x8a   :  { %v127_v34 = vadd.f32 %v119_v30, %v74_v33  ;;  %v95_v35 = vpop.permute.xlu0 %94  ;;  %v701_v30 = vld [vmem:[%s1019_s1 + $0x23] ss:$0 sm:$0xff] }
  0x8b   :  { %v120_v36 = vmul.f32 %v692_v18, %v95_v35  ;;  %v46_v37 = vpop.permute.xlu1 %45 }
  0x8c   :  { %v75_v38 = vmul.f32 %v691_v17, %v46_v37  ;;  %v140_v39 = vadd.f32 %v693_v25, %v127_v34  ;;  %v683_v34 = vstv %s1020_s2 }
  0x8e   :  { %v128_v40 = vadd.f32 %v120_v36, %v75_v38  ;;  %v99_v41 = vpop.permute.xlu0 %98 }
  0x8f   :  { %v121_v42 = vmul.f32 %v692_v18, %v99_v41  ;;  %v51_v43 = vpop.permute.xlu1 %50 }
  0x90   :  { %v76_v44 = vmul.f32 %v691_v17, %v51_v43  ;;  %v938_v45 = vadd.f32 %v693_v25, %v128_v40 }
  0x92   :  { %v129_v46 = vadd.f32 %v121_v42, %v76_v44  ;;  %v103_v47 = vpop.permute.xlu0 %102 }
  0x93   :  { %v122_v48 = vmul.f32 %v692_v18, %v103_v47  ;;  %v56_v49 = vpop.permute.xlu1 %55 }
  0x94   :  { %v77_v50 = vmul.f32 %v691_v17, %v56_v49  ;;  %v940_v51 = vadd.f32 %v693_v25, %v129_v46 }
  0x96   :  { %v824_v52 = vpop.eup %823  ;;  %v130_v53 = vadd.f32 %v122_v48, %v77_v50  ;;  %v107_v54 = vpop.permute.xlu0 %106 }
  0x97   :  { %v123_v55 = vmul.f32 %v692_v18, %v107_v54  ;;  %v61_v56 = vpop.permute.xlu1 %60  ;;  %746 = vmatmul.mubr.msk.f32.vlgmr.msra.gmra.mxu0 %vm147_vm1, %v824_v52 }
  0x98   :  { %v78_v57 = vmul.f32 %v691_v17, %v61_v56  ;;  %760 = vmatpush3.msra.mxu0 %v879_v7  ;;  %767 = vmatprep.mubr.msk.f32.mxu0 %vm842_vm0, %v841_v6  ;;  %v946_v58 = vadd.f32 %v693_v25, %v130_v53 }
  0x99   :  { %761 = vmatprep.subr.mxu0 %v841_v6 }
  0x9a   :  { %v131_v59 = vadd.f32 %v123_v55, %v78_v57  ;;  %v111_v60 = vpop.permute.xlu0 %110  ;;  %762 = vmatpush3.msra.mxu0 %v889_v9 }
  0x9b   :  { %v124_v61 = vmul.f32 %v692_v18, %v111_v60  ;;  %v66_v62 = vpop.permute.xlu1 %65  ;;  %763 = vmatprep.subr.mxu0 %v841_v6 }
  0x9c   :  { %v79_v63 = vmul.f32 %v691_v17, %v66_v62  ;;  %764 = vmatpush3.msra.mxu0 %v898_v10  ;;  %v952_v0 = vadd.f32 %v693_v25, %v131_v59 }
  0x9d   :  { %765 = vmatprep.subr.mxu0 %v841_v6 }
  0x9e   :  { %v132_v1 = vadd.f32 %v124_v61, %v79_v63  ;;  %766 = vmatpush3.msra.mxu0 %v908_v12 }
  0x9f   :  { %781 = vmatprep.subr.mxu0 %v841_v6 }
  0xa0   :  { %v957_v2 = vadd.f32 %v693_v25, %v132_v1 }
 0x157   :  { %v217_v3 = vpop.f32.mrf.mxu0 }
 0x158   :  { %v221_v4 = vadd.f32 %v217_v3, %v139_v32 }
 0x159   :  { %v747_v5 = vpop.f32.mrf.mxu0 }
 0x15a   :  { %825 = vtanh.f32 %v221_v4 }
 0x167   :  { %v826_v8 = vpop.eup %825 }
 0x168   :  { %757 = vmatmul.mubr.msk.f32.vlgmr.msra.gmra.mxu1 %vm147_vm1, %v826_v8 }
 0x169   :  { %771 = vmatpush3.msra.mxu1 %v879_v7  ;;  %778 = vmatprep.mubr.msk.f32.mxu1 %vm842_vm0, %v841_v6 }
 0x16a   :  { %772 = vmatprep.subr.mxu1 %v841_v6 }
 0x16b   :  { %773 = vmatpush3.msra.mxu1 %v889_v9 }
 0x16c   :  { %774 = vmatprep.subr.mxu1 %v841_v6 }
 0x16d   :  { %775 = vmatpush3.msra.mxu1 %v898_v10 }
 0x16e   :  { %776 = vmatprep.subr.mxu1 %v841_v6 }
 0x16f   :  { %777 = vmatpush3.msra.mxu1 %v908_v12 }
 0x170   :  { %792 = vmatprep.subr.mxu1 %v841_v6 }
 0x228   :  { %v292_v11 = vpop.f32.mrf.mxu1 }
 0x229   :  { %v296_v13 = vadd.f32 %v292_v11, %v140_v39 }
 0x22a   :  { %v758_v14 = vpop.f32.mrf.mxu1 }
 0x22b   :  { %827 = vtanh.f32 %v296_v13 }
 0x238   :  { %v828_v15 = vpop.eup %827 }
 0x239   :  { %768 = vmatmul.mubr.msk.f32.vlgmr.msra.gmra.mxu0 %vm147_vm1, %v828_v15 }
 0x23a   :  { %782 = vmatpush3.msra.mxu0 %v879_v7  ;;  %789 = vmatprep.mubr.msk.f32.mxu0 %vm842_vm0, %v841_v6 }
 0x23b   :  { %783 = vmatprep.subr.mxu0 %v841_v6 }
 0x23c   :  { %784 = vmatpush3.msra.mxu0 %v889_v9 }
 0x23d   :  { %785 = vmatprep.subr.mxu0 %v841_v6 }
 0x23e   :  { %786 = vmatpush3.msra.mxu0 %v898_v10 }
 0x23f   :  { %787 = vmatprep.subr.mxu0 %v841_v6 }
 0x240   :  { %788 = vmatpush3.msra.mxu0 %v908_v12 }
 0x241   :  { %803 = vmatprep.subr.mxu0 %v841_v6 }
 0x2f9   :  { %v367_v16 = vpop.f32.mrf.mxu0 }
 0x2fa   :  { %v371_v17 = vadd.f32 %v367_v16, %v938_v45 }
 0x2fb   :  { %v769_v18 = vpop.f32.mrf.mxu0 }
 0x2fc   :  { %829 = vtanh.f32 %v371_v17 }
 0x309   :  { %v830_v19 = vpop.eup %829 }
 0x30a   :  { %779 = vmatmul.mubr.msk.f32.vlgmr.msra.gmra.mxu1 %vm147_vm1, %v830_v19 }
 0x30b   :  { %793 = vmatpush3.msra.mxu1 %v879_v7  ;;  %800 = vmatprep.mubr.msk.f32.mxu1 %vm842_vm0, %v841_v6 }
 0x30c   :  { %794 = vmatprep.subr.mxu1 %v841_v6 }
 0x30d   :  { %795 = vmatpush3.msra.mxu1 %v889_v9 }
 0x30e   :  { %796 = vmatprep.subr.mxu1 %v841_v6 }
 0x30f   :  { %797 = vmatpush3.msra.mxu1 %v898_v10 }
 0x310   :  { %798 = vmatprep.subr.mxu1 %v841_v6 }
 0x311   :  { %799 = vmatpush3.msra.mxu1 %v908_v12 }
 0x3ca   :  { %v442_v20 = vpop.f32.mrf.mxu1 }
 0x3cb   :  { %v446_v21 = vadd.f32 %v442_v20, %v940_v51 }
 0x3cc   :  { %v780_v22 = vpop.f32.mrf.mxu1 }
 0x3cd   :  { %831 = vtanh.f32 %v446_v21 }
 0x3da   :  { %v832_v23 = vpop.eup %831 }
 0x3db   :  { %790 = vmatmul.mubr.msk.f32.vlgmr.msra.gmra.mxu0 %vm147_vm1, %v832_v23 }
 0x3dc   :  { %804 = vmatpush3.msra.mxu0 %v879_v7  ;;  %811 = vmatprep.mubr.msk.f32.mxu0 %vm842_vm0, %v841_v6 }
 0x3dd   :  { %805 = vmatprep.subr.mxu0 %v841_v6 }
 0x3de   :  { %806 = vmatpush3.msra.mxu0 %v889_v9 }
 0x3df   :  { %807 = vmatprep.subr.mxu0 %v841_v6 }
 0x3e0   :  { %808 = vmatpush3.msra.mxu0 %v898_v10 }
 0x3e1   :  { %809 = vmatprep.subr.mxu0 %v841_v6 }
 0x3e2   :  { %810 = vmatpush3.msra.mxu0 %v908_v12 }
 0x49b   :  { %v517_v24 = vpop.f32.mrf.mxu0 }
 0x49c   :  { %v521_v25 = vadd.f32 %v517_v24, %v946_v58 }
 0x49d   :  { %v791_v26 = vpop.f32.mrf.mxu0 }
 0x49e   :  { %833 = vtanh.f32 %v521_v25 }
 0x4ab   :  { %v834_v7 = vpop.eup %833 }
 0x4ac   :  { %801 = vmatmul.mubr.msk.f32.vlgmr.msra.gmra.mxu1 %vm147_vm1, %v834_v7 }
 0x56c   :  { %v592_v27 = vpop.f32.mrf.mxu1 }
 0x56d   :  { %v596_v28 = vadd.f32 %v592_v27, %v952_v0 }
 0x56e   :  { %v802_v9 = vpop.f32.mrf.mxu1 }
 0x56f   :  { %835 = vtanh.f32 %v596_v28 }
 0x57c   :  { %v836_v29 = vpop.eup %835 }
 0x57d   :  { %812 = vmatmul.mubr.msk.f32.vlgmr.msra.gmra.mxu0 %vm147_vm1, %v836_v29 }
 0x63d   :  { %v667_v10 = vpop.f32.mrf.mxu0 }
 0x63e   :  { %v671_v6 = vadd.f32 %v667_v10, %v957_v2 }
 0x63f   :  { %v813_v12 = vpop.f32.mrf.mxu0 }
 0x640   :  { %837 = vtanh.f32 %v671_v6 }
 0x64d   :  { %v838_v31 = vpop.eup %837 }
 0x64e   :  { %v678_v32 = vmul.f32 %v838_v31, %v701_v30 }
 0x650   :  { %v679_v33 = vsel %vm147_vm1, %v678_v32, 0.0 }
 0x651   :  { %680 = vadd.xlane.f32.xlu1 %v679_v33 }
 0x6da   :  { %v681_v35 = vpop.xlane.xlu1 %680 }
 0x6db   :  { %v684_v36 = vadd.f32 %v683_v34, %v681_v35 }
 0x6dd   :  { %686 = vst.msk [vmem:[%s1021_s3] sm:$0xff] %vm685_vm2, %v684_v36 }

</bundles_post_ra>
